<compile_context>
chip_gen: v5e
topology: v5e:2x2
jax: 0.10.0
libtpu: 0.0.40
codegen_flags: <defaults>
</compile_context>

<pallas_src>
import functools
import math

import jax
import jax.numpy as jnp
from jax.experimental import pallas as pl
from jax.experimental.pallas import tpu as pltpu


def _pick_tile(dim, target, align):
    """Largest tile <= target that divides `dim` and is a multiple of `align`.
    The full dimension is always a legal fallback."""
    if dim <= target:
        return dim
    cand = (target // align) * align
    while cand >= align:
        if dim % cand == 0:
            return cand
        cand -= align
    return dim


def _moco_neg_kernel(q_ref, mem_ref, lneg_ref, *, inv_temp):
    # Negative logits for this (batch tile, queue tile): q @ mem_tile.T on the
    # MXU with f32 accumulation regardless of the streaming dtype.
    lneg = jax.lax.dot_general(
        q_ref[...],
        mem_ref[...],
        dimension_numbers=(((1,), (1,)), ((), ())),
        preferred_element_type=jnp.float32,
    )
    lneg_ref[...] = (lneg * inv_temp).astype(lneg_ref.dtype)


def _moco_pos_kernel(q_ref, k_ref, lpos_ref, *, inv_temp):
    # Positive logits: per-row dot product, computed once for the whole batch.
    lpos = jnp.sum(
        q_ref[...].astype(jnp.float32) * k_ref[...].astype(jnp.float32),
        axis=-1,
        keepdims=True,
    )
    lpos_ref[...] = (lpos * inv_temp).astype(lpos_ref.dtype)


def memory_moco_forward(q, k, k_all, memory, index, temperature=0.07, *,
                        tq=None, tb=None, out_dtype=jnp.float32):
    """Returns (out, new_memory, new_index) matching MemoryMoCo.forward.

    q, k, k_all, memory may be f32 or bf16; logits are accumulated in f32 and
    emitted as `out_dtype`.
    """
    B, D = q.shape
    Q, Dm = memory.shape
    assert Dm == D, "memory feature dim must match q"

    # Tile sizes: large, lane-dense queue tiles (amortize per-step overhead),
    # batch tiling only kicks in for large B.
    tq = _pick_tile(Q, 2048 if tq is None else tq, 128)
    tb = _pick_tile(B, 256 if tb is None else tb, 8)

    inv_temp = 1.0 / temperature
    out_itemsize = jnp.dtype(out_dtype).itemsize

    # ----- l_pos: tiny single-shot kernel ------------------------------------
    l_pos = pl.pallas_call(
        functools.partial(_moco_pos_kernel, inv_temp=inv_temp),
        out_shape=jax.ShapeDtypeStruct((B, 1), out_dtype),
        grid=(1,),
        in_specs=[
            pl.BlockSpec((B, D), lambda i: (0, 0)),
            pl.BlockSpec((B, D), lambda i: (0, 0)),
        ],
        out_specs=pl.BlockSpec((B, 1), lambda i: (0, 0)),
    )(q, k)

    # ----- l_neg: batch x queue grid, fully parallel --------------------------
    cost = pl.CostEstimate(
        flops=2 * B * Q * D,
        transcendentals=0,
        bytes_accessed=(Q * D * memory.dtype.itemsize
                        + 2 * B * D * q.dtype.itemsize
                        + B * Q * out_itemsize),
    )

    l_neg = pl.pallas_call(
        functools.partial(_moco_neg_kernel, inv_temp=inv_temp),
        out_shape=jax.ShapeDtypeStruct((B, Q), out_dtype),
        grid_spec=pltpu.PrefetchScalarGridSpec(
            num_scalar_prefetch=0,
            grid=(B // tb, Q // tq),
            in_specs=[
                pl.BlockSpec((tb, D), lambda i, j: (i, 0)),   # q tile (resident per i)
                pl.BlockSpec((tq, D), lambda i, j: (j, 0)),   # memory tile (streamed)
            ],
            out_specs=pl.BlockSpec((tb, tq), lambda i, j: (i, j)),  # lane-dense
        ),
        compiler_params=pltpu.CompilerParams(
            dimension_semantics=("parallel", "parallel"),
        ),
        cost_estimate=cost,
    )(q, memory)

    # ----- glue: concat + momentum queue update (torch.no_grad() block) -------
    out = jnp.concatenate([l_pos, l_neg], axis=1)

    all_size = k_all.shape[0]
    out_ids = jnp.mod(jnp.arange(all_size, dtype=jnp.int32) + index, Q)
    new_memory = memory.at[out_ids].set(k_all.astype(memory.dtype))
    new_index = (index + all_size) % Q
    return out, new_memory, new_index


if __name__ == "__main__":
    # Small shapes consistent with the module.
    feature_dim = 32
    queue_size = 256
    batch = 8
    temperature = 0.07

    key = jax.random.PRNGKey(0)
    kq, kk, kall, kmem = jax.random.split(key, 4)

    q = jax.random.normal(kq, (batch, feature_dim), dtype=jnp.float32)
    k = jax.random.normal(kk, (batch, feature_dim), dtype=jnp.float32)
    k_all = jax.random.normal(kall, (batch, feature_dim), dtype=jnp.float32)

    # Deterministic init mirroring torch.rand(...).mul_(2*stdv).add_(-stdv)
    stdv = 1.0 / math.sqrt(feature_dim / 3)
    memory = jax.random.uniform(
        kmem, (queue_size, feature_dim), dtype=jnp.float32,
        minval=-stdv, maxval=stdv,
    )
    index = 0

    # ---- f32 path: exact check against the plain-JAX reference ----
    out, new_memory, new_index = memory_moco_forward(
        q, k, k_all, memory, index, temperature
    )
    out = jax.block_until_ready(out)
    new_memory = jax.block_until_ready(new_memory)

    l_pos_ref = jnp.sum(q * k, axis=-1, keepdims=True)
    l_neg_ref = q @ memory.T
    out_ref = jnp.concatenate([l_pos_ref, l_neg_ref], axis=1) / temperature
    assert out.shape == (batch, 1 + queue_size)
    assert jnp.allclose(out, out_ref, atol=1e-4, rtol=1e-4)

    out_ids = jnp.mod(jnp.arange(batch) + index, queue_size)
    mem_ref = memory.at[out_ids].set(k_all)
    assert jnp.allclose(new_memory, mem_ref)
    assert int(new_index) == (index + batch) % queue_size

    # ---- bf16 streaming path (the production configuration): smoke test ----
    # Queue and embeddings streamed in bf16 halve HBM traffic; accumulation is
    # still f32 on the MXU. Only a sanity check here (precision differs from
    # the f32 reference by bf16 rounding).
    out_bf16, _, _ = memory_moco_forward(
        q.astype(jnp.bfloat16), k.astype(jnp.bfloat16),
        k_all.astype(jnp.bfloat16), memory.astype(jnp.bfloat16),
        index, temperature,
    )
    out_bf16 = jax.block_until_ready(out_bf16)
    assert out_bf16.shape == (batch, 1 + queue_size)
    assert bool(jnp.all(jnp.isfinite(out_bf16)))

    print("KERNEL_OK")
</pallas_src>

<mosaic_0001>
module attributes {stable_mosaic.version = 11 : i64} {
  func.func @_moco_pos_kernel(%arg0: i32, %arg1: memref<8x32xf32, #tpu.memory_space<vmem>>, %arg2: memref<8x32xf32, #tpu.memory_space<vmem>>, %arg3: memref<8x1xf32, #tpu.memory_space<vmem>>) attributes {dimension_semantics = [#tpu.dimension_semantics<arbitrary>], iteration_bounds = array<i64: 1>, scalar_prefetch = 0 : i64, scratch_operands = 0 : i64, tpu.core_type = #tpu.core_type<tc>, window_params = [{pipeline_mode = #tpu.pipeline_mode<synchronous>, transform_indices = @transform_0, window_bounds = array<i64: 8, 32>}, {pipeline_mode = #tpu.pipeline_mode<synchronous>, transform_indices = @transform_1, window_bounds = array<i64: 8, 32>}, {pipeline_mode = #tpu.pipeline_mode<synchronous>, transform_indices = @transform_2, window_bounds = array<i64: 8, 1>}]} {
    %c0 = arith.constant 0 : index
    %c0_0 = arith.constant 0 : index
    %0 = vector.load %arg1[%c0, %c0_0] : memref<8x32xf32, #tpu.memory_space<vmem>>, vector<8x32xf32>
    %c0_1 = arith.constant 0 : index
    %c0_2 = arith.constant 0 : index
    %1 = vector.load %arg2[%c0_1, %c0_2] : memref<8x32xf32, #tpu.memory_space<vmem>>, vector<8x32xf32>
    %2 = arith.mulf %0, %1 : vector<8x32xf32>
    %cst = arith.constant dense<0.000000e+00> : vector<8xf32>
    %3 = vector.multi_reduction <add>, %2, %cst [1] : vector<8x32xf32> to vector<8xf32>
    %4 = vector.shape_cast %3 : vector<8xf32> to vector<8x1xf32>
    %cst_3 = arith.constant 14.2857141 : f32
    %5 = vector.broadcast %cst_3 : f32 to vector<8x1xf32>
    %6 = arith.mulf %4, %5 : vector<8x1xf32>
    %c0_4 = arith.constant 0 : index
    %c0_5 = arith.constant 0 : index
    %7 = vector.load %arg3[%c0_4, %c0_5] : memref<8x1xf32, #tpu.memory_space<vmem>>, vector<8x1xf32>
    tpu.vector_store %arg3[%c0_4, %c0_5], %6 {strides = array<i32>} : memref<8x1xf32, #tpu.memory_space<vmem>>, vector<8x1xf32>,
    return
  }
  func.func @transform_0(%arg0: i32) -> (i32, i32) {
    %c0_i32 = arith.constant 0 : i32
    %c0_i32_0 = arith.constant 0 : i32
    %c0_i32_1 = arith.constant 0 : i32
    return %c0_i32, %c0_i32_0 : i32, i32
  }
  func.func @transform_1(%arg0: i32) -> (i32, i32) {
    %c0_i32 = arith.constant 0 : i32
    %c0_i32_0 = arith.constant 0 : i32
    %c0_i32_1 = arith.constant 0 : i32
    return %c0_i32, %c0_i32_0 : i32, i32
  }
  func.func @transform_2(%arg0: i32) -> (i32, i32) {
    %c0_i32 = arith.constant 0 : i32
    %c0_i32_0 = arith.constant 0 : i32
    %c0_i32_1 = arith.constant 0 : i32
    return %c0_i32, %c0_i32_0 : i32, i32
  }
}

</mosaic_0001>

<bundles_post_ra>
// kernel: tpu_custom_call.1
= control target key start
LH: loop header
LB: loop body
LE: loop exit
PB: predicated region body
PF: predicated region fallthrough
CT: control target
= control target key end

     0   :  { %7 = vsyncpa [#allocation3], 0  ;;  %s135_s0 = inlined_call_operand.hbm [shape: f32[8,32], index: 0, kind: input, shape index: {}]   ;;  %s136_s1 = inlined_call_operand.hbm [shape: f32[8,32], index: 1, kind: input, shape index: {}]   ;;  %s137_s2 = inlined_call_operand.vmem [shape: f32[8,1], index: 2, kind: output, shape index: {}]  }
   0x1   :  { %s14_s11 = sshll.u32 %s135_s0, 4  ;;  %s15_s11 = int_to_ptr.hbm [resolvable:$true] %s14_s11 }
   0x2   :  { %8 = vsyncpa [#allocation5], 0  ;;  %s109_s12 = smov [#allocation2]   ;;  %s25_s16 = sshll.u32 %s136_s1, 4  ;;  %s26_s16 = int_to_ptr.hbm [resolvable:$true] %s25_s16 }
   0x3   :  { %s16_s13 = sshll.u32 %s109_s12, 4  ;;  %s110_s17 = smov [#allocation4]   ;;  %s17_s13 = int_to_ptr.vmem [resolvable:$true] %s16_s13 }
   0x4   :  { %19 = dma.hbm_to_vmem [thread:$0]  %s15_s11, 128, %s17_s13, [#allocation3]  }
   0x5   :  { %s27_s18 = sshll.u32 %s110_s17, 4  ;;  %s28_s18 = int_to_ptr.vmem [resolvable:$true] %s27_s18 }
   0x6   :  { %30 = dma.hbm_to_vmem [thread:$0]  %s26_s16, 128, %s28_s18, [#allocation5]  }
   0x7   :  { %105 = dma.done.wait [#allocation3], 128  }
   0x8   :  { %106 = vsyncadd [#allocation3], 4294967168 }
   0x9   :  { %107 = dma.done.wait [#allocation5], 128  }
   0xa   :  { %108 = vsyncadd [#allocation5], 4294967168  ;;  %v39_v0 = vld [vmem:[#allocation2] sm:$0xff]  ;;  %v40_v1 = vld [vmem:[#allocation4] sm:$0xff]  ;;  %vm42_vm0 = vcmask 261120   ;;  %vm47_vm1 = vcmask 7168  }
   0xb   :  { %v41_v2 = vmul.f32 %v40_v1, %v39_v0 }
   0xd   :  { %v43_v3 = vsel %vm42_vm0, %v41_v2, 0.0 }
   0xe   :  { %44 = vadd.xlane.f32.xlu0 %v43_v3 }
  0x81   :  { %v45_v4 = vpop.xlane.xlu0 %44 }
  0x82   :  { %v46_v5 = vmul.f32 14.285714, %v45_v4 }
  0x84   :  { %48 = vst.msk [vmem:[%s137_s2] sm:$0xff] %vm47_vm1, %v46_v5 }
  0x85   :  { %53 = vsyncpa [#allocation3], 1 }
  0x86   :  { %54 = vsyncpa [#allocation5], 1 }

</bundles_post_ra>
